<compile_context>
chip_gen: v7x
topology: tpu7x:2x2x1
jax: 0.10.0
libtpu: 0.0.40
codegen_flags: <defaults>
</compile_context>

<pallas_src>
import functools

import jax
import jax.numpy as jnp
from jax.experimental import pallas as pl
from jax.experimental.pallas import tpu as pltpu


def _siamese_kernel(x_ref, v_ref,
                    w1_ref, b1_ref, w2_ref, b2_ref,
                    wc1_ref, bc1_ref, wc2_ref, bc2_ref,
                    rec_ref, cls_ref, *, eps):
    # Current batch tile, compute in f32.
    x = x_ref[...].astype(jnp.float32)
    v = v_ref[...].astype(jnp.float32)

    w1 = w1_ref[...].astype(jnp.float32)
    b1 = b1_ref[...].astype(jnp.float32)
    w2 = w2_ref[...].astype(jnp.float32)
    b2 = b2_ref[...].astype(jnp.float32)

    def recognition_head(e):
        h = jnp.dot(e, w1, preferred_element_type=jnp.float32) + b1
        h = jnp.maximum(h, 0.0)                       # ReLU (VPU)
        return jnp.dot(h, w2, preferred_element_type=jnp.float32) + b2

    xh = recognition_head(x)
    vh = recognition_head(v)

    # torch.nn.functional.pairwise_distance: ||x1 - x2 + eps||_2 along the last dim.
    d = xh - vh + eps
    rec_ref[...] = jnp.sqrt(jnp.sum(d * d, axis=-1, keepdims=True)).astype(rec_ref.dtype)

    wc1 = wc1_ref[...].astype(jnp.float32)
    bc1 = bc1_ref[...].astype(jnp.float32)
    wc2 = wc2_ref[...].astype(jnp.float32)
    bc2 = bc2_ref[...].astype(jnp.float32)

    hc = jnp.maximum(jnp.dot(x, wc1, preferred_element_type=jnp.float32) + bc1, 0.0)
    cls_ref[...] = (jnp.dot(hc, wc2, preferred_element_type=jnp.float32) + bc2).astype(cls_ref.dtype)


def _pick_batch_tile(b):
    # Largest sublane-aligned tile that divides the batch; falls back to the full batch.
    # Kept modest so two input tiles x 2 pipeline buffers fit comfortably even under
    # v7x's 64 MiB VMEM / v5e's 16 MiB scoped default.
    for t in (512, 256, 128, 64, 32, 16, 8):
        if b % t == 0:
            return t
    return b


def siamese_forward(input_embedding, validation_embedding, params, *, eps=1e-6):
    """Pallas implementation of SiameseNetwork.forward (applied to embeddings).

    params layout (weights stored (in, out), i.e. already transposed vs torch):
      rec_w1 (A,A), rec_b1 (A,), rec_w2 (A,A//2), rec_b2 (A//2,)
      cls_w1 (A,A), cls_b1 (A,), cls_w2 (A,C),    cls_b2 (C,)
    """
    x = jnp.asarray(input_embedding)
    v = jnp.asarray(validation_embedding)
    assert x.shape == v.shape and x.ndim == 2
    B, A = x.shape

    w1, b1 = params["rec_w1"], params["rec_b1"]
    w2, b2 = params["rec_w2"], params["rec_b2"]
    wc1, bc1 = params["cls_w1"], params["cls_b1"]
    wc2, bc2 = params["cls_w2"], params["cls_b2"]
    A2 = w2.shape[1]
    C = wc2.shape[1]

    # Biases as (1, dim) rows so they broadcast over the batch tile inside the kernel.
    b1 = b1.reshape(1, A)
    b2 = b2.reshape(1, A2)
    bc1 = bc1.reshape(1, A)
    bc2 = bc2.reshape(1, C)

    tb = _pick_batch_tile(B)
    grid = (B // tb,)
    out_dtype = x.dtype

    tile_map = lambda i: (i, 0)   # batch-tiled arrays
    rep_map = lambda i: (0, 0)    # weights/biases: same block every step (stay resident)

    rec2d, cls = pl.pallas_call(
        functools.partial(_siamese_kernel, eps=float(eps)),
        out_shape=(
            jax.ShapeDtypeStruct((B, 1), out_dtype),
            jax.ShapeDtypeStruct((B, C), out_dtype),
        ),
        grid_spec=pltpu.PrefetchScalarGridSpec(
            num_scalar_prefetch=0,
            grid=grid,
            in_specs=[
                pl.BlockSpec((tb, A), tile_map),   # input embeddings
                pl.BlockSpec((tb, A), tile_map),   # validation embeddings
                pl.BlockSpec((A, A), rep_map),     # rec_w1
                pl.BlockSpec((1, A), rep_map),     # rec_b1
                pl.BlockSpec((A, A2), rep_map),    # rec_w2
                pl.BlockSpec((1, A2), rep_map),    # rec_b2
                pl.BlockSpec((A, A), rep_map),     # cls_w1
                pl.BlockSpec((1, A), rep_map),     # cls_b1
                pl.BlockSpec((A, C), rep_map),     # cls_w2
                pl.BlockSpec((1, C), rep_map),     # cls_b2
            ],
            out_specs=(
                pl.BlockSpec((tb, 1), tile_map),   # recognition distance (per row)
                pl.BlockSpec((tb, C), tile_map),   # classification logits
            ),
        ),
        compiler_params=pltpu.CompilerParams(
            dimension_semantics=("parallel",),     # batch tiles are independent
        ),
    )(x, v, w1, b1, w2, b2, wc1, bc1, wc2, bc2)

    return rec2d[:, 0], cls


if __name__ == "__main__":
    key = jax.random.PRNGKey(0)
    keys = jax.random.split(key, 10)

    B, A, C = 8, 32, 4          # batch, num_attributes, num_classes
    A2 = A // 2

    # TODO(synk): embedding_model is an injected external nn.Module; it is treated as
    # identity here, so the kernel consumes (B, A) embeddings ("images") directly.
    x = jax.random.normal(keys[0], (B, A), jnp.float32)
    v = jax.random.normal(keys[1], (B, A), jnp.float32)

    s = 0.1
    params = dict(
        rec_w1=s * jax.random.normal(keys[2], (A, A), jnp.float32),
        rec_b1=s * jax.random.normal(keys[3], (A,), jnp.float32),
        rec_w2=s * jax.random.normal(keys[4], (A, A2), jnp.float32),
        rec_b2=s * jax.random.normal(keys[5], (A2,), jnp.float32),
        cls_w1=s * jax.random.normal(keys[6], (A, A), jnp.float32),
        cls_b1=s * jax.random.normal(keys[7], (A,), jnp.float32),
        cls_w2=s * jax.random.normal(keys[8], (A, C), jnp.float32),
        cls_b2=s * jax.random.normal(keys[9], (C,), jnp.float32),
    )

    rec, cls = siamese_forward(x, v, params)
    jax.block_until_ready((rec, cls))

    # Pure-JAX reference (same formula).
    def head(e, w_a, b_a, w_b, b_b):
        return jnp.maximum(e @ w_a + b_a, 0.0) @ w_b + b_b

    xh = head(x, params["rec_w1"], params["rec_b1"], params["rec_w2"], params["rec_b2"])
    vh = head(v, params["rec_w1"], params["rec_b1"], params["rec_w2"], params["rec_b2"])
    rec_ref = jnp.sqrt(jnp.sum((xh - vh + 1e-6) ** 2, axis=-1))
    cls_ref = head(x, params["cls_w1"], params["cls_b1"], params["cls_w2"], params["cls_b2"])

    assert rec.shape == (B,), rec.shape
    assert cls.shape == (B, C), cls.shape
    assert jnp.allclose(rec, rec_ref, rtol=1e-5, atol=1e-5), (rec, rec_ref)
    assert jnp.allclose(cls, cls_ref, rtol=1e-5, atol=1e-5), (cls, cls_ref)

    print("KERNEL_OK")
</pallas_src>

<mosaic_0001>
module attributes {stable_mosaic.version = 11 : i64} {
  func.func @_siamese_kernel(%arg0: i32, %arg1: memref<8x32xf32, #tpu.memory_space<vmem>>, %arg2: memref<8x32xf32, #tpu.memory_space<vmem>>, %arg3: memref<32x32xf32, #tpu.memory_space<vmem>>, %arg4: memref<1x32xf32, #tpu.memory_space<vmem>>, %arg5: memref<32x16xf32, #tpu.memory_space<vmem>>, %arg6: memref<1x16xf32, #tpu.memory_space<vmem>>, %arg7: memref<32x32xf32, #tpu.memory_space<vmem>>, %arg8: memref<1x32xf32, #tpu.memory_space<vmem>>, %arg9: memref<32x4xf32, #tpu.memory_space<vmem>>, %arg10: memref<1x4xf32, #tpu.memory_space<vmem>>, %arg11: memref<8x1xf32, #tpu.memory_space<vmem>>, %arg12: memref<8x4xf32, #tpu.memory_space<vmem>>) attributes {dimension_semantics = [#tpu.dimension_semantics<parallel>], iteration_bounds = array<i64: 1>, scalar_prefetch = 0 : i64, scratch_operands = 0 : i64, tpu.core_type = #tpu.core_type<tc>, window_params = [{transform_indices = @transform_0, window_bounds = array<i64: 8, 32>}, {transform_indices = @transform_1, window_bounds = array<i64: 8, 32>}, {pipeline_mode = #tpu.pipeline_mode<synchronous>, transform_indices = @transform_2, window_bounds = array<i64: 32, 32>}, {pipeline_mode = #tpu.pipeline_mode<synchronous>, transform_indices = @transform_3, window_bounds = array<i64: 1, 32>}, {pipeline_mode = #tpu.pipeline_mode<synchronous>, transform_indices = @transform_4, window_bounds = array<i64: 32, 16>}, {pipeline_mode = #tpu.pipeline_mode<synchronous>, transform_indices = @transform_5, window_bounds = array<i64: 1, 16>}, {pipeline_mode = #tpu.pipeline_mode<synchronous>, transform_indices = @transform_6, window_bounds = array<i64: 32, 32>}, {pipeline_mode = #tpu.pipeline_mode<synchronous>, transform_indices = @transform_7, window_bounds = array<i64: 1, 32>}, {pipeline_mode = #tpu.pipeline_mode<synchronous>, transform_indices = @transform_8, window_bounds = array<i64: 32, 4>}, {pipeline_mode = #tpu.pipeline_mode<synchronous>, transform_indices = @transform_9, window_bounds = array<i64: 1, 4>}, {transform_indices = @transform_10, window_bounds = array<i64: 8, 1>}, {transform_indices = @transform_11, window_bounds = array<i64: 8, 4>}]} {
    %c0 = arith.constant 0 : index
    %c0_0 = arith.constant 0 : index
    %0 = vector.load %arg1[%c0, %c0_0] : memref<8x32xf32, #tpu.memory_space<vmem>>, vector<8x32xf32>
    %c0_1 = arith.constant 0 : index
    %c0_2 = arith.constant 0 : index
    %1 = vector.load %arg2[%c0_1, %c0_2] : memref<8x32xf32, #tpu.memory_space<vmem>>, vector<8x32xf32>
    %c0_3 = arith.constant 0 : index
    %c0_4 = arith.constant 0 : index
    %2 = vector.load %arg3[%c0_3, %c0_4] : memref<32x32xf32, #tpu.memory_space<vmem>>, vector<32x32xf32>
    %c0_5 = arith.constant 0 : index
    %c0_6 = arith.constant 0 : index
    %3 = vector.load %arg4[%c0_5, %c0_6] : memref<1x32xf32, #tpu.memory_space<vmem>>, vector<1x32xf32>
    %c0_7 = arith.constant 0 : index
    %c0_8 = arith.constant 0 : index
    %4 = vector.load %arg5[%c0_7, %c0_8] : memref<32x16xf32, #tpu.memory_space<vmem>>, vector<32x16xf32>
    %c0_9 = arith.constant 0 : index
    %c0_10 = arith.constant 0 : index
    %5 = vector.load %arg6[%c0_9, %c0_10] : memref<1x16xf32, #tpu.memory_space<vmem>>, vector<1x16xf32>
    %cst = arith.constant dense<0.000000e+00> : vector<8x32xf32>
    %6 = tpu.matmul %0, %2, %cst {dimension_numbers = #tpu.dot_dimension_numbers<[1], [0], [0], [1], [0, 0, 1, 1], [], []>} : vector<8x32xf32>, vector<32x32xf32>, vector<8x32xf32> -> vector<8x32xf32>
    %7 = vector.broadcast %3 : vector<1x32xf32> to vector<8x32xf32>
    %8 = arith.addf %6, %7 : vector<8x32xf32>
    %cst_11 = arith.constant 0.000000e+00 : f32
    %9 = vector.broadcast %cst_11 : f32 to vector<8x32xf32>
    %10 = arith.maximumf %8, %9 : vector<8x32xf32>
    %cst_12 = arith.constant dense<0.000000e+00> : vector<8x16xf32>
    %11 = tpu.matmul %10, %4, %cst_12 {dimension_numbers = #tpu.dot_dimension_numbers<[1], [0], [0], [1], [0, 0, 1, 1], [], []>} : vector<8x32xf32>, vector<32x16xf32>, vector<8x16xf32> -> vector<8x16xf32>
    %12 = vector.broadcast %5 : vector<1x16xf32> to vector<8x16xf32>
    %13 = arith.addf %11, %12 : vector<8x16xf32>
    %cst_13 = arith.constant dense<0.000000e+00> : vector<8x32xf32>
    %14 = tpu.matmul %1, %2, %cst_13 {dimension_numbers = #tpu.dot_dimension_numbers<[1], [0], [0], [1], [0, 0, 1, 1], [], []>} : vector<8x32xf32>, vector<32x32xf32>, vector<8x32xf32> -> vector<8x32xf32>
    %15 = vector.broadcast %3 : vector<1x32xf32> to vector<8x32xf32>
    %16 = arith.addf %14, %15 : vector<8x32xf32>
    %cst_14 = arith.constant 0.000000e+00 : f32
    %17 = vector.broadcast %cst_14 : f32 to vector<8x32xf32>
    %18 = arith.maximumf %16, %17 : vector<8x32xf32>
    %cst_15 = arith.constant dense<0.000000e+00> : vector<8x16xf32>
    %19 = tpu.matmul %18, %4, %cst_15 {dimension_numbers = #tpu.dot_dimension_numbers<[1], [0], [0], [1], [0, 0, 1, 1], [], []>} : vector<8x32xf32>, vector<32x16xf32>, vector<8x16xf32> -> vector<8x16xf32>
    %20 = vector.broadcast %5 : vector<1x16xf32> to vector<8x16xf32>
    %21 = arith.addf %19, %20 : vector<8x16xf32>
    %22 = arith.subf %13, %21 : vector<8x16xf32>
    %cst_16 = arith.constant 9.99999997E-7 : f32
    %23 = vector.broadcast %cst_16 : f32 to vector<8x16xf32>
    %24 = arith.addf %22, %23 : vector<8x16xf32>
    %25 = arith.mulf %24, %24 : vector<8x16xf32>
    %cst_17 = arith.constant dense<0.000000e+00> : vector<8xf32>
    %26 = vector.multi_reduction <add>, %25, %cst_17 [1] : vector<8x16xf32> to vector<8xf32>
    %27 = vector.shape_cast %26 : vector<8xf32> to vector<8x1xf32>
    %28 = math.sqrt %27 : vector<8x1xf32>
    %c0_18 = arith.constant 0 : index
    %c0_19 = arith.constant 0 : index
    %29 = vector.load %arg11[%c0_18, %c0_19] : memref<8x1xf32, #tpu.memory_space<vmem>>, vector<8x1xf32>
    tpu.vector_store %arg11[%c0_18, %c0_19], %28 {strides = array<i32>} : memref<8x1xf32, #tpu.memory_space<vmem>>, vector<8x1xf32>,
    %c0_20 = arith.constant 0 : index
    %c0_21 = arith.constant 0 : index
    %30 = vector.load %arg7[%c0_20, %c0_21] : memref<32x32xf32, #tpu.memory_space<vmem>>, vector<32x32xf32>
    %c0_22 = arith.constant 0 : index
    %c0_23 = arith.constant 0 : index
    %31 = vector.load %arg8[%c0_22, %c0_23] : memref<1x32xf32, #tpu.memory_space<vmem>>, vector<1x32xf32>
    %c0_24 = arith.constant 0 : index
    %c0_25 = arith.constant 0 : index
    %32 = vector.load %arg9[%c0_24, %c0_25] : memref<32x4xf32, #tpu.memory_space<vmem>>, vector<32x4xf32>
    %c0_26 = arith.constant 0 : index
    %c0_27 = arith.constant 0 : index
    %33 = vector.load %arg10[%c0_26, %c0_27] : memref<1x4xf32, #tpu.memory_space<vmem>>, vector<1x4xf32>
    %cst_28 = arith.constant dense<0.000000e+00> : vector<8x32xf32>
    %34 = tpu.matmul %0, %30, %cst_28 {dimension_numbers = #tpu.dot_dimension_numbers<[1], [0], [0], [1], [0, 0, 1, 1], [], []>} : vector<8x32xf32>, vector<32x32xf32>, vector<8x32xf32> -> vector<8x32xf32>
    %35 = vector.broadcast %31 : vector<1x32xf32> to vector<8x32xf32>
    %36 = arith.addf %34, %35 : vector<8x32xf32>
    %cst_29 = arith.constant 0.000000e+00 : f32
    %37 = vector.broadcast %cst_29 : f32 to vector<8x32xf32>
    %38 = arith.maximumf %36, %37 : vector<8x32xf32>
    %cst_30 = arith.constant dense<0.000000e+00> : vector<8x4xf32>
    %39 = tpu.matmul %38, %32, %cst_30 {dimension_numbers = #tpu.dot_dimension_numbers<[1], [0], [0], [1], [0, 0, 1, 1], [], []>} : vector<8x32xf32>, vector<32x4xf32>, vector<8x4xf32> -> vector<8x4xf32>
    %40 = vector.broadcast %33 : vector<1x4xf32> to vector<8x4xf32>
    %41 = arith.addf %39, %40 : vector<8x4xf32>
    %c0_31 = arith.constant 0 : index
    %c0_32 = arith.constant 0 : index
    %42 = vector.load %arg12[%c0_31, %c0_32] : memref<8x4xf32, #tpu.memory_space<vmem>>, vector<8x4xf32>
    tpu.vector_store %arg12[%c0_31, %c0_32], %41 {strides = array<i32>} : memref<8x4xf32, #tpu.memory_space<vmem>>, vector<8x4xf32>,
    return
  }
  func.func @transform_0(%arg0: i32) -> (i32, i32) {
    %c0_i32 = arith.constant 0 : i32
    %c0_i32_0 = arith.constant 0 : i32
    return %arg0, %c0_i32 : i32, i32
  }
  func.func @transform_1(%arg0: i32) -> (i32, i32) {
    %c0_i32 = arith.constant 0 : i32
    %c0_i32_0 = arith.constant 0 : i32
    return %arg0, %c0_i32 : i32, i32
  }
  func.func @transform_2(%arg0: i32) -> (i32, i32) {
    %c0_i32 = arith.constant 0 : i32
    %c0_i32_0 = arith.constant 0 : i32
    %c0_i32_1 = arith.constant 0 : i32
    return %c0_i32, %c0_i32_0 : i32, i32
  }
  func.func @transform_3(%arg0: i32) -> (i32, i32) {
    %c0_i32 = arith.constant 0 : i32
    %c0_i32_0 = arith.constant 0 : i32
    %c0_i32_1 = arith.constant 0 : i32
    return %c0_i32, %c0_i32_0 : i32, i32
  }
  func.func @transform_4(%arg0: i32) -> (i32, i32) {
    %c0_i32 = arith.constant 0 : i32
    %c0_i32_0 = arith.constant 0 : i32
    %c0_i32_1 = arith.constant 0 : i32
    return %c0_i32, %c0_i32_0 : i32, i32
  }
  func.func @transform_5(%arg0: i32) -> (i32, i32) {
    %c0_i32 = arith.constant 0 : i32
    %c0_i32_0 = arith.constant 0 : i32
    %c0_i32_1 = arith.constant 0 : i32
    return %c0_i32, %c0_i32_0 : i32, i32
  }
  func.func @transform_6(%arg0: i32) -> (i32, i32) {
    %c0_i32 = arith.constant 0 : i32
    %c0_i32_0 = arith.constant 0 : i32
    %c0_i32_1 = arith.constant 0 : i32
    return %c0_i32, %c0_i32_0 : i32, i32
  }
  func.func @transform_7(%arg0: i32) -> (i32, i32) {
    %c0_i32 = arith.constant 0 : i32
    %c0_i32_0 = arith.constant 0 : i32
    %c0_i32_1 = arith.constant 0 : i32
    return %c0_i32, %c0_i32_0 : i32, i32
  }
  func.func @transform_8(%arg0: i32) -> (i32, i32) {
    %c0_i32 = arith.constant 0 : i32
    %c0_i32_0 = arith.constant 0 : i32
    %c0_i32_1 = arith.constant 0 : i32
    return %c0_i32, %c0_i32_0 : i32, i32
  }
  func.func @transform_9(%arg0: i32) -> (i32, i32) {
    %c0_i32 = arith.constant 0 : i32
    %c0_i32_0 = arith.constant 0 : i32
    %c0_i32_1 = arith.constant 0 : i32
    return %c0_i32, %c0_i32_0 : i32, i32
  }
  func.func @transform_10(%arg0: i32) -> (i32, i32) {
    %c0_i32 = arith.constant 0 : i32
    %c0_i32_0 = arith.constant 0 : i32
    return %arg0, %c0_i32 : i32, i32
  }
  func.func @transform_11(%arg0: i32) -> (i32, i32) {
    %c0_i32 = arith.constant 0 : i32
    %c0_i32_0 = arith.constant 0 : i32
    return %arg0, %c0_i32 : i32, i32
  }
}

</mosaic_0001>

<bundles_post_ra>
// kernel: tpu_custom_call.1
= control target key start
LH: loop header
LB: loop body
LE: loop exit
PB: predicated region body
PF: predicated region fallthrough
CT: control target
= control target key end

     0   :  { %v695_v0 = vmov 0.0|0.0   ;;  %vm696_vm0 = vmmov 0   ;;  %v697_v4 = vmov 0.0   ;;  %vm55_vm1 = vcmask 261120   ;;  %s860_s2 = inlined_call_operand.vmem [shape: f32[32,32], index: 2, kind: input, shape index: {}]   ;;  %s861_s4 = inlined_call_operand.vmem [shape: f32[32,16], index: 4, kind: input, shape index: {}]   ;;  %s862_s0 = inlined_call_operand.vmem [shape: f32[8,32], index: 0, kind: input, shape index: {}]   ;;  %s863_s6 = inlined_call_operand.vmem [shape: f32[32,32], index: 6, kind: input, shape index: {}]   ;;  %s864_s1 = inlined_call_operand.vmem [shape: f32[8,32], index: 1, kind: input, shape index: {}]   ;;  %s865_s3 = inlined_call_operand.vmem [shape: f32[1,32], index: 3, kind: input, shape index: {}]   ;;  %s866_s8 = inlined_call_operand.vmem [shape: f32[32,4], index: 8, kind: input, shape index: {}]   ;;  %s867_s7 = inlined_call_operand.vmem [shape: f32[1,32], index: 7, kind: input, shape index: {}]   ;;  %s868_s5 = inlined_call_operand.vmem [shape: f32[1,16], index: 5, kind: input, shape index: {}]   ;;  %s869_s9 = inlined_call_operand.vmem [shape: f32[1,4], index: 9, kind: input, shape index: {}]   ;;  %s870_s11 = inlined_call_operand.vmem [shape: f32[8,4], index: 11, kind: output, shape index: {1}]   ;;  %s871_s10 = inlined_call_operand.vmem [shape: f32[8,1], index: 10, kind: output, shape index: {0}]  }
   0x1   :  { %654 = vmatprep.subr.bf16.mxu0 %v695_v0  ;;  %v39_v1 = vld [vmem:[%s860_s2] sm:$0xff]  ;;  %v40_v2 = vld [vmem:[%s860_s2 + $0x8] sm:$0xff]  ;;  %v41_v3 = vld [vmem:[%s860_s2 + $0x10] sm:$0xff]  ;;  %596 = vmatprep.mubr.msk.f32.mxu0 %vm696_vm0, %v697_v4  ;;  %vm359_vm2 = vcmask 130048   ;;  %vm538_vm3 = vcmask 31744   ;;  %vm370_vm5 = vcmask 7168  }
   0x2   :  { %v655_v5 = vpack.c.bf16 %v40_v2, %v39_v1  ;;  %v42_v6 = vld [vmem:[%s860_s2 + $0x18] sm:$0xff]  ;;  %660 = vmatprep.subr.bf16.mxu1 %v695_v0  ;;  %607 = vmatprep.mubr.msk.f32.mxu1 %vm696_vm0, %v697_v4  ;;  %v44_v8 = vld [vmem:[%s861_s4] sm:$0xff]  ;;  %v45_v9 = vld [vmem:[%s861_s4 + $0x8] sm:$0xff] }
   0x3   :  { %v658_v7 = vpack.c.bf16 %v42_v6, %v41_v3  ;;  %v661_v10 = vpack.c.bf16 %v45_v9, %v44_v8  ;;  %v37_v11 = vld [vmem:[%s862_s0] sm:$0xff]  ;;  %v373_v13 = vld [vmem:[%s863_s6 + $0x8] sm:$0xff]  ;;  %v374_v16 = vld [vmem:[%s863_s6 + $0x10] sm:$0xff] }
   0x4   :  { %656 = vmatpush3.bf16.msra.mxu0 %v655_v5  ;;  %v372_v12 = vld [vmem:[%s863_s6] sm:$0xff]  ;;  %v375_v17 = vld [vmem:[%s863_s6 + $0x18] sm:$0xff]  ;;  %v46_v19 = vld [vmem:[%s861_s4 + $0x10] sm:$0xff] }
   0x5   :  { %657 = vmatprep.subr.bf16.mxu0 %v695_v0  ;;  %662 = vmatpush3.bf16.msra.mxu1 %v661_v10  ;;  %v38_v14 = vld [vmem:[%s864_s1] sm:$0xff]  ;;  %v679_v15 = vpack.c.bf16 %v373_v13, %v372_v12  ;;  %v682_v18 = vpack.c.bf16 %v375_v17, %v374_v16  ;;  %v47_v20 = vld [vmem:[%s861_s4 + $0x18] sm:$0xff]  ;;  %v378_v28 = vld [vmem:[%s866_s8 + $0x8] sm:$0xff] }
   0x6   :  { %663 = vmatprep.subr.bf16.mxu1 %v695_v0  ;;  %v664_v21 = vpack.c.bf16 %v47_v20, %v46_v19  ;;  %v548_v22 = vld [vmem:[%s865_s3] ss:$0 sm:$0xff]  ;;  %v379_v34 = vld [vmem:[%s866_s8 + $0x10] sm:$0xff]  ;;  %v380_v35 = vld [vmem:[%s866_s8 + $0x18] sm:$0xff] }
   0x7   :  { %v377_v27 = vld [vmem:[%s866_s8] sm:$0xff]  ;;  %v688_v37 = vpack.c.bf16 %v380_v35, %v379_v34 }
   0x8   :  { %659 = vmatpush3.bf16.msra.mxu0 %v658_v7  ;;  %v685_v32 = vpack.c.bf16 %v378_v28, %v377_v27  ;;  %v554_v36 = vld [vmem:[%s867_s7] ss:$0 sm:$0xff] }
   0x9   :  { %666 = vmatprep.subr.bf16.mxu0 %v695_v0  ;;  %665 = vmatpush3.bf16.msra.mxu1 %v664_v21  ;;  %v550_v44 = vld [vmem:[%s868_s5] ss:$0 sm:$0xff] }
   0xa   :  { %672 = vmatprep.subr.bf16.mxu1 %v695_v0  ;;  %v556_v54 = vld [vmem:[%s869_s9] ss:$0 sm:$0xff] }
   0xb   :  { %597 = vmatmul.mubr.msk.f32.vlgmr.msra.gmra.mrb[0].mxu0 %vm55_vm1, %v37_v11 }
   0xc   :  { %668 = vmatpush3.bf16.msra.mxu0 %v655_v5  ;;  %618 = vmatprep.mubr.msk.f32.mxu0 %vm696_vm0, %v697_v4 }
   0xd   :  { %669 = vmatprep.subr.bf16.mxu0 %v695_v0 }
  0x10   :  { %671 = vmatpush3.bf16.msra.mxu0 %v658_v7 }
  0x11   :  { %678 = vmatprep.subr.bf16.mxu0 %v695_v0 }
  0x13   :  { %619 = vmatmul.mubr.msk.f32.vlgmr.msra.gmra.mrb[2].mxu0 %vm55_vm1, %v38_v14 }
  0x14   :  { %680 = vmatpush3.bf16.msra.mxu0 %v679_v15  ;;  %640 = vmatprep.mubr.msk.f32.mxu0 %vm696_vm0, %v697_v4 }
  0x15   :  { %681 = vmatprep.subr.bf16.mxu0 %v695_v0 }
  0x18   :  { %683 = vmatpush3.bf16.msra.mxu0 %v682_v18 }
  0x1b   :  { %641 = vmatmul.mubr.msk.f32.vlgmr.msra.gmra.mrb[4].mxu0 %vm55_vm1, %v37_v11 }
  0xde   :  { %v125_v23 = vpop.f32.mrb[0].mxu0 }
  0xdf   :  { %v126_v24 = vadd.f32 %v548_v22, %v125_v23  ;;  %v598_v25 = vpop.f32.mrb[1].mxu0 }
  0xe1   :  { %v129_v26 = vmax.f32 %v126_v24, 0.0 }
  0xe3   :  { %608 = vmatmul.mubr.msk.f32.vlgmr.msra.gmra.mrb[0].mxu1 %vm55_vm1, %v129_v26 }
  0xe4   :  { %674 = vmatpush3.bf16.msra.mxu1 %v661_v10  ;;  %629 = vmatprep.mubr.msk.f32.mxu1 %vm696_vm0, %v697_v4 }
  0xe5   :  { %675 = vmatprep.subr.bf16.mxu1 %v695_v0 }
  0xe6   :  { %v278_v29 = vpop.f32.mrb[2].mxu0 }
  0xe7   :  { %v279_v30 = vadd.f32 %v548_v22, %v278_v29  ;;  %v620_v31 = vpop.f32.mrb[3].mxu0 }
  0xe8   :  { %677 = vmatpush3.bf16.msra.mxu1 %v664_v21 }
  0xe9   :  { %v282_v33 = vmax.f32 %v279_v30, 0.0  ;;  %684 = vmatprep.subr.bf16.mxu1 %v695_v0 }
  0xeb   :  { %630 = vmatmul.mubr.msk.f32.vlgmr.msra.gmra.mrb[2].mxu1 %vm55_vm1, %v282_v33 }
  0xec   :  { %686 = vmatpush3.bf16.msra.mxu1 %v685_v32  ;;  %651 = vmatprep.mubr.msk.f32.mxu1 %vm696_vm0, %v697_v4 }
  0xed   :  { %687 = vmatprep.subr.bf16.mxu1 %v695_v0 }
  0xee   :  { %v454_v38 = vpop.f32.mrb[4].mxu0 }
  0xef   :  { %v455_v39 = vadd.f32 %v554_v36, %v454_v38  ;;  %v642_v40 = vpop.f32.mrb[5].mxu0 }
  0xf0   :  { %689 = vmatpush3.bf16.msra.mxu1 %v688_v37 }
  0xf1   :  { %v458_v41 = vmax.f32 %v455_v39, 0.0 }
  0xf3   :  { %652 = vmatmul.mubr.msk.f32.vlgmr.msra.gmra.mrb[4].mxu1 %vm55_vm1, %v458_v41 }
 0x1b6   :  { %v205_v42 = vpop.f32.mrb[0].mxu1 }
 0x1b7   :  { %v609_v43 = vpop.f32.mrb[1].mxu1  ;;  %v206_v46 = vadd.f32 %v550_v44, %v205_v42 }
 0x1be   :  { %v352_v45 = vpop.f32.mrb[2].mxu1 }
 0x1bf   :  { %v353_v47 = vadd.f32 %v550_v44, %v352_v45  ;;  %v631_v48 = vpop.f32.mrb[3].mxu1 }
 0x1c1   :  { %v356_v49 = vsub.f32 %v206_v46, %v353_v47 }
 0x1c3   :  { %v357_v50 = vadd.f32 1e-06, %v356_v49 }
 0x1c5   :  { %v358_v51 = vmul.f32 %v357_v50, %v357_v50 }
 0x1c6   :  { %v534_v53 = vpop.f32.mrb[4].mxu1 }
 0x1c7   :  { %v360_v52 = vsel %vm359_vm2, %v358_v51, 0.0  ;;  %v653_v55 = vpop.f32.mrb[5].mxu1  ;;  %v535_v56 = vadd.f32 %v556_v54, %v534_v53 }
 0x1c8   :  { %361 = vadd.xlane.f32.xlu0 %v360_v52 }
 0x1c9   :  { %539 = vst.msk [vmem:[%s870_s11] sm:$0xff] %vm538_vm3, %v535_v56 }
 0x255   :  { %v362_v57 = vpop.xlane.xlu0 %361 }
 0x256   :  { %693 = vrsqrt.f32 %v362_v57  ;;  %vm365_vm4 = vcmp.eq.f32.partialorder %v362_v57, inf  ;;  %v368_v60 = vand.u32 2147483648, %v362_v57  ;;  %vm367_vm6 = vcmp.eq.f32.partialorder %v362_v57, 0.0 }
 0x260   :  { %v694_v58 = vpop.eup %693 }
 0x261   :  { %v364_v59 = vmul.f32 %v694_v58, %v362_v57 }
 0x263   :  { %v366_v61 = vsel %vm365_vm4, %v362_v57, %v364_v59 }
 0x264   :  { %v369_v62 = vsel %vm367_vm6, %v368_v60, %v366_v61 }
 0x265   :  { %371 = vst.msk [vmem:[%s871_s10] sm:$0xff] %vm370_vm5, %v369_v62 }

</bundles_post_ra>
